<compile_context>
chip_gen: v7x
topology: tpu7x:2x2x1
jax: 0.10.0
libtpu: 0.0.40
codegen_flags: <defaults>
</compile_context>

<pallas_src>
import jax
import jax.numpy as jnp
from jax import lax
from jax.experimental import pallas as pl
from jax.experimental.pallas import tpu as pltpu

LANES = 128
MAX_BLOCK_ROWS = 2048   # 2048*128*4B = 1 MiB per f32 input block.
                        # 2 inputs x 2 pipeline buffers + 2 f32 accumulators
                        # ~= 6 MiB VMEM: inside v5e's 16 MiB default scoped
                        # limit and far under v7x's 64 MiB.
NUM_CORES = 2           # shard the reduction across v7x's 2 TensorCores.


def _round_up(a, b):
    return ((a + b - 1) // b) * b


def _cdiv(a, b):
    return (a + b - 1) // b


def _sublane_multiple(dtype):
    # (8,128) f32 / (16,128) bf16 / (32,128) 8-bit packed tiles.
    return max(8, 32 // jnp.dtype(dtype).itemsize)


def _make_dice_kernel(total_rows, blocks_per_core, block_rows, needs_mask):
    def kernel(x_ref, t_ref, inter_ref, sum_ref, acc_xt, acc_s):
        c = pl.program_id(0)   # TensorCore shard ("parallel")
        i = pl.program_id(1)   # reduction step ("arbitrary")

        @pl.when(i == 0)
        def _init():
            acc_xt[...] = jnp.zeros_like(acc_xt)
            acc_s[...] = jnp.zeros_like(acc_s)

        x = x_ref[...].astype(jnp.float32)
        t = t_ref[...].astype(jnp.float32)

        if needs_mask:
            # Zero rows past the end of the array (partial last block and/or
            # phantom blocks of the second core shard). Cheap VPU work; the
            # kernel is HBM-bandwidth bound so the VPU has slack.
            logical_block = c * blocks_per_core + i
            limit = total_rows - logical_block * block_rows
            row = lax.broadcasted_iota(jnp.int32, x.shape, 0)
            valid = row < limit
            x = jnp.where(valid, x, 0.0)
            t = jnp.where(valid, t, 0.0)

        # Pure elementwise (VPU) accumulation; no per-step XLU reduce.
        acc_xt[...] += x * t
        acc_s[...] += x + t

        @pl.when(i == pl.num_programs(1) - 1)
        def _finalize():
            inter = jnp.sum(acc_xt[...])
            total = jnp.sum(acc_s[...])
            inter_ref[...] = jnp.full(inter_ref.shape, inter, jnp.float32)
            sum_ref[...] = jnp.full(sum_ref.shape, total, jnp.float32)

    return kernel


def dice_loss(inputs, targets, smooth=10000.0):
    x = jnp.reshape(inputs, (-1,))
    t = jnp.reshape(targets, (-1,))
    # Stream native floating dtypes (bf16 halves HBM traffic); only promote
    # non-float inputs (bool / int masks). In-kernel math is f32.
    if not jnp.issubdtype(x.dtype, jnp.floating):
        x = x.astype(jnp.float32)
    if not jnp.issubdtype(t.dtype, jnp.floating):
        t = t.astype(jnp.float32)

    n = x.shape[0]
    if n == 0:  # degenerate: dice == 1 -> loss == 0 (kernel never writes)
        return jnp.float32(0.0)

    m = max(_sublane_multiple(x.dtype), _sublane_multiple(t.dtype))
    rows = _cdiv(n, LANES)
    if rows < m:
        padded_rows = m            # tiny input: pad up to one minimum tile
        block_rows = m
    else:
        padded_rows = rows
        block_rows = min(MAX_BLOCK_ROWS, (rows // m) * m)

    pad = padded_rows * LANES - n
    if pad:  # only when n is not lane-aligned; zero padding is sum-safe
        x = jnp.pad(x, (0, pad))
        t = jnp.pad(t, (0, pad))
    x2 = x.reshape(padded_rows, LANES)
    t2 = t.reshape(padded_rows, LANES)

    nblocks = _cdiv(padded_rows, block_rows)
    bpc = _cdiv(nblocks, NUM_CORES)          # blocks per core shard
    needs_mask = (NUM_CORES * bpc * block_rows) != padded_rows

    def in_map(c, i):
        # Clamp phantom blocks of the last shard; their rows are masked anyway.
        return (jnp.minimum(c * bpc + i, nblocks - 1), 0)

    def out_map(c, i):
        return (c, 0, 0)

    kernel = _make_dice_kernel(padded_rows, bpc, block_rows, needs_mask)

    inter_parts, sum_parts = pl.pallas_call(
        kernel,
        out_shape=(
            jax.ShapeDtypeStruct((NUM_CORES, 8, LANES), jnp.float32),
            jax.ShapeDtypeStruct((NUM_CORES, 8, LANES), jnp.float32),
        ),
        grid_spec=pltpu.PrefetchScalarGridSpec(
            num_scalar_prefetch=0,
            grid=(NUM_CORES, bpc),
            in_specs=[
                pl.BlockSpec((block_rows, LANES), in_map),
                pl.BlockSpec((block_rows, LANES), in_map),
            ],
            out_specs=[
                pl.BlockSpec((1, 8, LANES), out_map),
                pl.BlockSpec((1, 8, LANES), out_map),
            ],
            scratch_shapes=[
                pltpu.VMEM((block_rows, LANES), jnp.float32),
                pltpu.VMEM((block_rows, LANES), jnp.float32),
            ],
        ),
        compiler_params=pltpu.CompilerParams(
            dimension_semantics=("parallel", "arbitrary"),
        ),
    )(x2, t2)

    # Combine the per-core partials (tiny scalar work; needed because the
    # outer axis is "parallel" so partial sums must be merged outside).
    inter = jnp.sum(inter_parts[:, 0, 0])
    total = jnp.sum(sum_parts[:, 0, 0])
    dice = (2.0 * inter + smooth) / (total + smooth)
    return 1.0 - dice


if __name__ == "__main__":
    key = jax.random.PRNGKey(0)
    k1, k2 = jax.random.split(key)

    # NCHW segmentation-style inputs (as the PyTorch module is typically used).
    x = jax.nn.sigmoid(jax.random.normal(k1, (2, 4, 16, 16), dtype=jnp.float32))
    y = (jax.random.uniform(k2, (2, 4, 16, 16)) > 0.5).astype(jnp.float32)

    loss = dice_loss(x, y)
    jax.block_until_ready(loss)

    def ref_dice(a, b, smooth=10000.0):
        a = a.reshape(-1).astype(jnp.float32)
        b = b.reshape(-1).astype(jnp.float32)
        inter = jnp.sum(a * b)
        return 1.0 - (2.0 * inter + smooth) / (jnp.sum(a) + jnp.sum(b) + smooth)

    ref = ref_dice(x, y)
    assert jnp.allclose(loss, ref, atol=1e-5, rtol=1e-5), (loss, ref)

    # Second check: bf16 inputs with a non-128-aligned element count exercises
    # the native-dtype pass-through, lane padding and in-kernel row masking.
    xb = jax.nn.sigmoid(jax.random.normal(k1, (2, 3, 20, 20))).astype(jnp.bfloat16)
    yb = (jax.random.uniform(k2, (2, 3, 20, 20)) > 0.5).astype(jnp.bfloat16)
    loss_b = dice_loss(xb, yb)
    jax.block_until_ready(loss_b)
    ref_b = ref_dice(xb, yb)
    assert jnp.allclose(loss_b, ref_b, atol=1e-3, rtol=1e-3), (loss_b, ref_b)

    print("KERNEL_OK")
</pallas_src>

<mosaic_0001>
module attributes {stable_mosaic.version = 11 : i64} {
  func.func @kernel(%arg0: i32, %arg1: i32, %arg2: memref<16x128xf32, #tpu.memory_space<vmem>>, %arg3: memref<16x128xf32, #tpu.memory_space<vmem>>, %arg4: memref<1x8x128xf32, #tpu.memory_space<vmem>>, %arg5: memref<1x8x128xf32, #tpu.memory_space<vmem>>, %arg6: memref<16x128xf32, #tpu.memory_space<vmem>>, %arg7: memref<16x128xf32, #tpu.memory_space<vmem>>) attributes {dimension_semantics = [#tpu.dimension_semantics<parallel>, #tpu.dimension_semantics<arbitrary>], iteration_bounds = array<i64: 2, 1>, scalar_prefetch = 0 : i64, scratch_operands = 2 : i64, tpu.core_type = #tpu.core_type<tc>, window_params = [{transform_indices = @transform_0, window_bounds = array<i64: 16, 128>}, {transform_indices = @transform_1, window_bounds = array<i64: 16, 128>}, {transform_indices = @transform_2, window_bounds = array<i64: 1, 8, 128>}, {transform_indices = @transform_3, window_bounds = array<i64: 1, 8, 128>}]} {
    %c0_i32 = arith.constant 0 : i32
    %0 = arith.cmpi eq, %arg1, %c0_i32 : i32
    %1 = arith.extui %0 : i1 to i32
    %c0_i32_0 = arith.constant 0 : i32
    %2 = arith.cmpi ne, %1, %c0_i32_0 : i32
    scf.if %2 {
      %cst_16 = arith.constant 0.000000e+00 : f32
      %27 = vector.broadcast %cst_16 : f32 to vector<16x128xf32>
      %c0_17 = arith.constant 0 : index
      %c0_18 = arith.constant 0 : index
      %28 = vector.load %arg6[%c0_17, %c0_18] : memref<16x128xf32, #tpu.memory_space<vmem>>, vector<16x128xf32>
      tpu.vector_store %arg6[%c0_17, %c0_18], %27 {strides = array<i32>} : memref<16x128xf32, #tpu.memory_space<vmem>>, vector<16x128xf32>,
      %cst_19 = arith.constant 0.000000e+00 : f32
      %29 = vector.broadcast %cst_19 : f32 to vector<16x128xf32>
      %c0_20 = arith.constant 0 : index
      %c0_21 = arith.constant 0 : index
      %30 = vector.load %arg7[%c0_20, %c0_21] : memref<16x128xf32, #tpu.memory_space<vmem>>, vector<16x128xf32>
      tpu.vector_store %arg7[%c0_20, %c0_21], %29 {strides = array<i32>} : memref<16x128xf32, #tpu.memory_space<vmem>>, vector<16x128xf32>,
    } else {
    }
    %c0 = arith.constant 0 : index
    %c0_1 = arith.constant 0 : index
    %3 = vector.load %arg2[%c0, %c0_1] : memref<16x128xf32, #tpu.memory_space<vmem>>, vector<16x128xf32>
    %c0_2 = arith.constant 0 : index
    %c0_3 = arith.constant 0 : index
    %4 = vector.load %arg3[%c0_2, %c0_3] : memref<16x128xf32, #tpu.memory_space<vmem>>, vector<16x128xf32>
    %c1_i32 = arith.constant 1 : i32
    %5 = arith.muli %arg0, %c1_i32 : i32
    %6 = arith.addi %5, %arg1 : i32
    %c16_i32 = arith.constant 16 : i32
    %7 = arith.muli %6, %c16_i32 : i32
    %c16_i32_4 = arith.constant 16 : i32
    %8 = arith.subi %c16_i32_4, %7 : i32
    %9 = tpu.iota {dimensions = array<i32: 0>} : vector<16x128xi32>
    %10 = vector.broadcast %8 : i32 to vector<16x128xi32>
    %11 = arith.cmpi slt, %9, %10 : vector<16x128xi32>
    %cst = arith.constant 0.000000e+00 : f32
    %12 = vector.broadcast %cst : f32 to vector<16x128xf32>
    %13 = arith.select %11, %3, %12 : vector<16x128xi1>, vector<16x128xf32>
    %cst_5 = arith.constant 0.000000e+00 : f32
    %14 = vector.broadcast %cst_5 : f32 to vector<16x128xf32>
    %15 = arith.select %11, %4, %14 : vector<16x128xi1>, vector<16x128xf32>
    %c0_6 = arith.constant 0 : index
    %c0_7 = arith.constant 0 : index
    %16 = vector.load %arg6[%c0_6, %c0_7] : memref<16x128xf32, #tpu.memory_space<vmem>>, vector<16x128xf32>
    %17 = arith.mulf %13, %15 : vector<16x128xf32>
    %18 = arith.addf %16, %17 : vector<16x128xf32>
    %c0_8 = arith.constant 0 : index
    %c0_9 = arith.constant 0 : index
    %19 = vector.load %arg6[%c0_8, %c0_9] : memref<16x128xf32, #tpu.memory_space<vmem>>, vector<16x128xf32>
    tpu.vector_store %arg6[%c0_8, %c0_9], %18 {strides = array<i32>} : memref<16x128xf32, #tpu.memory_space<vmem>>, vector<16x128xf32>,
    %c0_10 = arith.constant 0 : index
    %c0_11 = arith.constant 0 : index
    %20 = vector.load %arg7[%c0_10, %c0_11] : memref<16x128xf32, #tpu.memory_space<vmem>>, vector<16x128xf32>
    %21 = arith.addf %13, %15 : vector<16x128xf32>
    %22 = arith.addf %20, %21 : vector<16x128xf32>
    %c0_12 = arith.constant 0 : index
    %c0_13 = arith.constant 0 : index
    %23 = vector.load %arg7[%c0_12, %c0_13] : memref<16x128xf32, #tpu.memory_space<vmem>>, vector<16x128xf32>
    tpu.vector_store %arg7[%c0_12, %c0_13], %22 {strides = array<i32>} : memref<16x128xf32, #tpu.memory_space<vmem>>, vector<16x128xf32>,
    %c0_i32_14 = arith.constant 0 : i32
    %24 = arith.cmpi eq, %arg1, %c0_i32_14 : i32
    %25 = arith.extui %24 : i1 to i32
    %c0_i32_15 = arith.constant 0 : i32
    %26 = arith.cmpi ne, %25, %c0_i32_15 : i32
    scf.if %26 {
      %c0_16 = arith.constant 0 : index
      %c0_17 = arith.constant 0 : index
      %27 = vector.load %arg6[%c0_16, %c0_17] : memref<16x128xf32, #tpu.memory_space<vmem>>, vector<16x128xf32>
      %28 = vector.shape_cast %27 : vector<16x128xf32> to vector<1x16x128xf32>
      %cst_18 = arith.constant dense<0.000000e+00> : vector<1xf32>
      %29 = vector.multi_reduction <add>, %28, %cst_18 [1, 2] : vector<1x16x128xf32> to vector<1xf32>
      %30 = vector.shape_cast %29 : vector<1xf32> to vector<1x1x1xf32>
      %31 = vector.extract %30[0, 0, 0] : f32 from vector<1x1x1xf32>
      %c0_19 = arith.constant 0 : index
      %c0_20 = arith.constant 0 : index
      %32 = vector.load %arg7[%c0_19, %c0_20] : memref<16x128xf32, #tpu.memory_space<vmem>>, vector<16x128xf32>
      %33 = vector.shape_cast %32 : vector<16x128xf32> to vector<1x16x128xf32>
      %cst_21 = arith.constant dense<0.000000e+00> : vector<1xf32>
      %34 = vector.multi_reduction <add>, %33, %cst_21 [1, 2] : vector<1x16x128xf32> to vector<1xf32>
      %35 = vector.shape_cast %34 : vector<1xf32> to vector<1x1x1xf32>
      %36 = vector.extract %35[0, 0, 0] : f32 from vector<1x1x1xf32>
      %37 = vector.broadcast %31 : f32 to vector<1x8x128xf32>
      %c0_22 = arith.constant 0 : index
      %c0_23 = arith.constant 0 : index
      %c0_24 = arith.constant 0 : index
      %38 = vector.load %arg4[%c0_22, %c0_23, %c0_24] : memref<1x8x128xf32, #tpu.memory_space<vmem>>, vector<1x8x128xf32>
      tpu.vector_store %arg4[%c0_22, %c0_23, %c0_24], %37 {strides = array<i32>} : memref<1x8x128xf32, #tpu.memory_space<vmem>>, vector<1x8x128xf32>,
      %39 = vector.broadcast %36 : f32 to vector<1x8x128xf32>
      %c0_25 = arith.constant 0 : index
      %c0_26 = arith.constant 0 : index
      %c0_27 = arith.constant 0 : index
      %40 = vector.load %arg5[%c0_25, %c0_26, %c0_27] : memref<1x8x128xf32, #tpu.memory_space<vmem>>, vector<1x8x128xf32>
      tpu.vector_store %arg5[%c0_25, %c0_26, %c0_27], %39 {strides = array<i32>} : memref<1x8x128xf32, #tpu.memory_space<vmem>>, vector<1x8x128xf32>,
    } else {
    }
    return
  }
  func.func @transform_0(%arg0: i32, %arg1: i32) -> (i32, i32) {
    %c1_i32 = arith.constant 1 : i32
    %0 = arith.muli %arg0, %c1_i32 : i32
    %1 = arith.addi %0, %arg1 : i32
    %c0_i32 = arith.constant 0 : i32
    %2 = arith.minsi %1, %c0_i32 : i32
    %c0_i32_0 = arith.constant 0 : i32
    %c0_i32_1 = arith.constant 0 : i32
    return %2, %c0_i32_0 : i32, i32
  }
  func.func @transform_1(%arg0: i32, %arg1: i32) -> (i32, i32) {
    %c1_i32 = arith.constant 1 : i32
    %0 = arith.muli %arg0, %c1_i32 : i32
    %1 = arith.addi %0, %arg1 : i32
    %c0_i32 = arith.constant 0 : i32
    %2 = arith.minsi %1, %c0_i32 : i32
    %c0_i32_0 = arith.constant 0 : i32
    %c0_i32_1 = arith.constant 0 : i32
    return %2, %c0_i32_0 : i32, i32
  }
  func.func @transform_2(%arg0: i32, %arg1: i32) -> (i32, i32, i32) {
    %c0_i32 = arith.constant 0 : i32
    %c0_i32_0 = arith.constant 0 : i32
    %c0_i32_1 = arith.constant 0 : i32
    return %arg0, %c0_i32, %c0_i32_0 : i32, i32, i32
  }
  func.func @transform_3(%arg0: i32, %arg1: i32) -> (i32, i32, i32) {
    %c0_i32 = arith.constant 0 : i32
    %c0_i32_0 = arith.constant 0 : i32
    %c0_i32_1 = arith.constant 0 : i32
    return %arg0, %c0_i32, %c0_i32_0 : i32, i32, i32
  }
}

</mosaic_0001>

<bundles_post_ra>
// kernel: tpu_custom_call.1
= control target key start
LH: loop header
LB: loop body
LE: loop exit
PB: predicated region body
PF: predicated region fallthrough
CT: control target
= control target key end

     0   :  { %9 = vsyncpa [#allocation5], 0  ;;  %s1113_s0 = inlined_call_operand.hbm [shape: f32[16,128], index: 0, kind: input, shape index: {}]   ;;  %s1114_s1 = inlined_call_operand.hbm [shape: f32[16,128], index: 1, kind: input, shape index: {}]   ;;  %s1115_s2 = inlined_call_operand.hbm [shape: f32[2,8,128], index: 2, kind: output, shape index: {0}]   ;;  %s1116_s3 = inlined_call_operand.hbm [shape: f32[2,8,128], index: 3, kind: output, shape index: {1}]  }
   0x1   :  { %11 = vsyncpa [#allocation5 + $0x1], 0 }
   0x2   :  { %12 = vsyncpa [#allocation8], 0 }
   0x3   :  { %14 = vsyncpa [#allocation8 + $0x1], 0 }
   0x4   :  { %15 = vsyncpa [#allocation6], 0 }
   0x5   :  { %17 = vsyncpa [#allocation6 + $0x1], 0 }
   0x6   :  { %18 = vsyncpa [#allocation11], 0 }
   0x7   :  { %20 = vsyncpa [#allocation11 + $0x1], 0  ;;  %s868_s12 = smov 0   ;;  %s870_s13 = smov 0  }
   0x8   :  { %s872_s14 = smov 0   ;;  %s874_s15 = smov 0  }
   0x9   :  { %s876_s16 = smov 0   ;;  %s878_s17 = smov 0  }
   0xa   :  { %s880_s18 = smov 0   ;;  %s882_s19 = smov 0  }
   0xb LB: > { %s515_s20 = sadd.s32 4294967295, %s840_s19   ;;  %s516_s21 = sadd.s32 4294967294, %s840_s19   ;;  %s840_s19 = sphi %s882_s19, %s26_s19   ;;  %s836_s18 = sphi %s880_s18, %s1135_s18   ;;  %s832_s17 = sphi %s878_s17, %s1134_s17   ;;  %s828_s16 = sphi %s876_s16, %s1103_s16   ;;  %s824_s15 = sphi %s874_s15, %s1133_s15   ;;  %s820_s14 = sphi %s872_s14, %s1132_s14   ;;  %s816_s13 = sphi %s870_s13, %s1131_s13   ;;  %s812_s12 = sphi %s868_s12, %s1130_s12  }
   0xc   : > { %s38_s22 = sadd.s32 1, %s836_s18  ;;  %p809_p1 = scmp.ne.s32.totalorder %s828_s16, 0 }
   0xd   : > { %p40_p0 = scmp.ge.s32.totalorder %s38_s22, 2  ;;  %p59_p2 = scmp.eq.s32.totalorder %s840_s19, 0 }
   0xe   : > { %p64_p3 = scmp.ne.s32.totalorder %s828_s16, %s824_s15  ;;  %p65_p5 = scmp.eq.s32.totalorder %s515_s20, 0 }
   0xf   : > { %s1137_s22 = smov (%p40_p0, %s38_s22), 0  ;;  %p914_p4 = por %p809_p1, %p59_p2 }
  0x10   : > { %p918_p6 = por %p65_p5, %p64_p3  ;;  %s106_s25 = ssub.s32 %s836_s18, %s1137_s22 }
  0x11   : > { %p107_p7 = scmp.eq.s32.totalorder %s106_s25, 0  ;;  %s109_s26 = sadd.s32 1, %s820_s14 }
  0x12   : > { %s1120_s24 = scalar_select %p918_p6, 1, 0 }
  0x13   : > { %s926_s27 = scalar_select %p107_p7, %s820_s14, %s109_s26  }
  0x14   : > { %p119_p8 = scmp.ne.s32.totalorder %s820_s14, %s816_s13  ;;  %p120_p9 = scmp.eq.s32.totalorder %s515_s20, 1 }
  0x15   : > { %p125_p10 = scmp.ne.s32.totalorder %s816_s13, %s812_s12  ;;  %p126_p11 = scmp.eq.s32.totalorder %s516_s21, 1 }
  0x16   : > { %p932_p12 = por %p120_p9, %p119_p8  ;;  %p565_p1 = scmp.lt.s32.totalorder %s840_s19, 2 }
  0x17   : > { %p937_p0 = por %p126_p11, %p125_p10  ;;  %s842_s30 = smov [#allocation4]  }
  0x18   : > { %s1121_s28 = scalar_select %p932_p12, 1, 0 }
  0x19   : > { %s1122_s29 = scalar_select %p937_p0, 1, 0 }
  0x1a   : > { %s186_s4 = sshll.u32 %s842_s30, 4  ;;  %p944_p2 = pnand %p565_p1, %p914_p4  ;;  %s187_s4 = int_to_ptr.vmem [resolvable:$true] %s186_s4 }
  0x1b   : > { %s641_s8 = scalar_lea.hbm %s1113_s0, 256 }
  0x1c   : > { %p642_p3 = scmp.ne.s32.totalorder %s1113_s0, %s641_s8  ;;  %p643_p5 = pneg %p944_p2 }
  0x1d   : > { %p648_p8 = scmp.lt.u32.totalorder %s641_s8, %s641_s8  ;;  %p650_p9 = scmp.lt.u32.totalorder %s641_s8, %s1113_s0 }
  0x1e   : > { %p644_p7 = pnand %p643_p5, %p642_p3 }
  0x1f   : > { %p651_p10 = por %p650_p9, %p648_p8 }
  0x20   : > { %p645_p4 = pneg %p644_p7 }
  0x22   : > { %p652_p11 = pnand %p651_p10, %p645_p4 }
  0x24   : > { %655 = shalt.err (!%p652_p11)
}
  0x25   : > { %s656_s20 = scalar_lea.vmem %s187_s4, 256  ;;  %s663_s21 = scalar_lea.vmem %s187_s4, 512 }
  0x26   : > { %p657_p1 = scmp.ne.s32.totalorder %s187_s4, %s656_s20  ;;  %p664_p12 = scmp.lt.s32.totalorder %s187_s4, %s187_s4 }
  0x27   : > { %p665_p6 = scmp.lt.s32.totalorder %s663_s21, %s656_s20 }
  0x28   : > { %p659_p13 = pnand %p657_p1, %p643_p5 }
  0x29   : > { %p666_p3 = por %p665_p6, %p664_p12 }
  0x2a   : > { %p660_p0 = pneg %p659_p13 }
  0x2c   : > { %p667_p7 = pnand %p666_p3, %p660_p0 }
  0x2e   : > { %670 = shalt.err (!%p667_p7)
}
  0x2f   : > { %s843_s23 = smov 128   ;;  %s844_s25 = smov 8  }
  0x30   : > { %554 = dma.hbm_to_vmem [thread:$0]  (!%p944_p2), %s1113_s0, 256, %s187_s4, [#allocation5], %s843_s23, %s843_s23, %s844_s25  }
  0x31   : > { %p525_p13 = scmp.ge.s32.totalorder %s840_s19, 1  ;;  %p218_p4 = scmp.lt.s32.totalorder %s840_s19, 3 }
  0x32   : > { %s845_s7 = smov [#allocation7]   ;;  %s671_s11 = scalar_lea.hbm %s1114_s1, 256 }
  0x33   : > { %p975_p8 = pnand %p525_p13, %p218_p4  ;;  %s210_s8 = sshll.u32 %s845_s7, 4  ;;  %s211_s8 = int_to_ptr.vmem [resolvable:$true] %s210_s8 }
  0x34   : > { %p672_p6 = scmp.ne.s32.totalorder %s1114_s1, %s671_s11  ;;  %p678_p9 = scmp.lt.u32.totalorder %s671_s11, %s671_s11 }
  0x35   : > { %s1124_s6 = scalar_select %p975_p8, 1, 0 }
  0x36   : > { %p674_p12 = pnand %p672_p6, %p643_p5  ;;  %p680_p10 = scmp.lt.u32.totalorder %s671_s11, %s1114_s1 }
  0x38   : > { %p675_p0 = pneg %p674_p12  ;;  %p681_p11 = por %p680_p10, %p678_p9 }
  0x3a   : > { %p682_p1 = pnand %p681_p11, %p675_p0 }
  0x3c   : > { %685 = shalt.err (!%p682_p1)
}
  0x3d   : > { %s686_s26 = scalar_lea.vmem %s211_s8, 256  ;;  %s693_s30 = scalar_lea.vmem %s211_s8, 512 }
  0x3e   : > { %p687_p3 = scmp.ne.s32.totalorder %s211_s8, %s686_s26  ;;  %p694_p4 = scmp.lt.s32.totalorder %s211_s8, %s211_s8 }
  0x3f   : > { %p695_p8 = scmp.lt.s32.totalorder %s693_s30, %s686_s26 }
  0x40   : > { %p689_p7 = pnand %p687_p3, %p643_p5 }
  0x41   : > { %p696_p6 = por %p695_p8, %p694_p4 }
  0x42   : > { %p690_p13 = pneg %p689_p7 }
  0x44   : > { %p697_p12 = pnand %p696_p6, %p690_p13 }
  0x46   : > { %700 = shalt.err (!%p697_p12)
}
  0x47   : > { %557 = dma.hbm_to_vmem [thread:$0]  (!%p944_p2), %s1114_s1, 256, %s211_s8, [#allocation8], %s843_s23, %s843_s23, %s844_s25  }
  0x48   : > { %p1125_p0 = scmp.ne.s32.totalorder %s1124_s6, 0 }
  0x49   : > { %s224_s10 = sand.u32 (!%p1125_p0), 1, %s828_s16   ;;  %p1126_p5 = scmp.ne.s32.totalorder (!%p1125_p0), %s1120_s24, 0 }
  0x4a   : > { %222 = sbr.rel (%p1125_p0) target bundleno = 339 (0x153), region = 28  ;;  %s526_s11 = sshll.u32 (!%p1125_p0), %s224_s10, 4 }
  0x4b   : > { %s225_s15 = scalar_lea.sflag (!%p1125_p0), [#allocation5], %s224_s10  ;;  %s228_s20 = scalar_lea.vmem (!%p1125_p0), [#allocation4], %s526_s11 }
  0x51   : > { %794 = dma.done.wait (%p1126_p5), %s225_s15, 256  }
  0x52   : > { %796 = vsyncadd (%p1126_p5), %s225_s15, 4294967040  ;;  %s234_s5 = scalar_lea.sflag [#allocation8], %s224_s10  ;;  %s237_s4 = scalar_lea.vmem [#allocation7], %s526_s11 }
  0x53   : > { %798 = dma.done.wait (%p1126_p5), %s234_s5, 256  }
  0x54   : > { %800 = vsyncadd (%p1126_p5), %s234_s5, 4294967040  ;;  %s530_s23 = sshll.u32 %s832_s17, 4  ;;  %v293_v0 = vlaneseq  ;;  %v286_v4 = vld [vmem:[%s228_s20] sm:$0xff]  ;;  %v287_v5 = vld [vmem:[%s228_s20 + $0x8] sm:$0xff]  ;;  %s1015_s24 = sand.u32 1, %s816_s13  }
  0x55   : > { %s292_s25 = ssub.s32 16, %s530_s23  ;;  %v288_v6 = vld [vmem:[%s237_s4] sm:$0xff]  ;;  %v289_v7 = vld [vmem:[%s237_s4 + $0x8] sm:$0xff]  ;;  %s528_s6 = sshll.u32 %s1015_s24, 3 }
  0x56   : > { %v294_v1 = vshrl.u32 %v293_v0, 7  ;;  %v296_v2 = vstv %s292_s25  ;;  %s533_s8 = sshll.u32 %s832_s17, 7  ;;  %s262_s21 = scalar_lea.vmem [#allocation9], %s528_s6 }
  0x57   : > { %s369_s26 = sshll.u32 %s262_s21, 4  ;;  %s1019_s30 = scalar_lea.vmem [#allocation10], %s528_s6  ;;  %s1029_s26 = int_to_ptr.vmem [resolvable:$true] %s369_s26 }
  0x58   : > { %v295_v3 = vadd.s32 8, %v294_v1  ;;  %vm297_vm0 = vcmp.lt.s32.totalorder %v294_v1, %v296_v2  ;;  %s382_s7 = sshll.u32 %s1019_s30, 4  ;;  %s1027_s11 = scalar_lea.hbm %s1115_s2, %s533_s8  ;;  %s1031_s7 = int_to_ptr.vmem [resolvable:$true] %s382_s7 }
  0x59   : > { %v299_v8 = vsel %vm297_vm0, %v286_v4, 0.0  ;;  %v301_v10 = vsel %vm297_vm0, %v288_v6, 0.0  ;;  %s351_s20 = scalar_lea.sflag [#allocation6], %s1015_s24  ;;  %s701_s5 = scalar_lea.vmem %s1029_s26, 128 }
  0x5a   : > { %vm298_vm1 = vcmp.lt.s32.totalorder %v295_v3, %v296_v2  ;;  %v305_v12 = vmul.f32 %v301_v10, %v299_v8  ;;  %v313_v14 = vadd.f32 %v301_v10, %v299_v8  ;;  %p702_p2 = scmp.ne.s32.totalorder %s1029_s26, %s701_s5  ;;  %p1127_p8 = scmp.ne.s32.totalorder %s1121_s28, 0 }
  0x5b   : > { %v300_v9 = vsel %vm298_vm1, %v287_v5, 0.0  ;;  %v302_v11 = vsel %vm298_vm1, %v289_v7, 0.0  ;;  %s846_s4 = smov [#allocation9]  }
  0x5c   : > { %v306_v13 = vmul.f32 %v302_v11, %v300_v9  ;;  %v314_v15 = vadd.f32 %v302_v11, %v300_v9  ;;  %p703_p9 = pnand %p702_p2, %p1127_p8  ;;  %s705_s23 = sshll.u32 %s846_s4, 4  ;;  %s706_s23 = int_to_ptr.vmem [resolvable:$false] %s705_s23 }
  0x5d   : > { %s707_s25 = scalar_lea.vmem %s706_s23, 256  ;;  %p708_p11 = scmp.lt.s32.totalorder %s1029_s26, %s706_s23 }
  0x5e   : > { %v324_v16 = vadd.f32 %v306_v13, %v305_v12  ;;  %v336_v17 = vadd.f32 %v314_v15, %v313_v14  ;;  %p704_p10 = pneg %p703_p9  ;;  %p709_p1 = scmp.lt.s32.totalorder %s707_s25, %s701_s5 }
  0x60   : > { %325 = vadd.xlane.f32.xlu0 %v324_v16  ;;  %p710_p3 = por %p709_p1, %p708_p11 }
  0x62   : > { %p711_p7 = pnand %p710_p3, %p704_p10 }
  0x64   : > { %337 = vadd.xlane.f32.xlu0 %v336_v17 }
  0xed   : > { %v326_v18 = vpop.xlane.xlu0 %325 }
  0xee   : > { %v327_v19 = vrot.slane %v326_v18, 4 }
  0xf0   : > { %v328_v20 = vadd.f32 %v327_v19, %v326_v18 }
  0xf1   : > { %v338_v21 = vpop.xlane.xlu0 %337 }
  0xf2   : > { %v329_v22 = vrot.slane %v328_v20, 2  ;;  %v339_v23 = vrot.slane %v338_v21, 4 }
  0xf4   : > { %v340_v24 = vadd.f32 %v339_v23, %v338_v21  ;;  %v330_v25 = vadd.f32 %v329_v22, %v328_v20 }
  0xf6   : > { %v341_v26 = vrot.slane %v340_v24, 2  ;;  %v331_v27 = vrot.slane %v330_v25, 1 }
  0xf8   : > { %v342_v28 = vadd.f32 %v341_v26, %v340_v24  ;;  %v332_v29 = vadd.f32 %v331_v27, %v330_v25 }
  0xfa   : > { %539 = vpush %v332_v29  ;;  %v343_v30 = vrot.slane %v342_v28, 1 }
  0xfc   : > { %v344_v31 = vadd.f32 %v343_v30, %v342_v28 }
  0xfe   : > { %541 = vpush %v344_v31 }
 0x12b   : > { %s540_s15 = spop %539 }
 0x12c   : > { %v346_v32 = vstv %s540_s15 }
 0x12d   : > { %347 = vst [vmem:[%s262_s21] sm:$0xff] %v346_v32 }
 0x12e   : > { %714 = shalt.err (!%p711_p7)
}
 0x12f   : > { %s715_s6 = scalar_lea.hbm %s1027_s11, 128  ;;  %s719_s10 = scalar_lea.hbm %s1115_s2, 256 }
 0x130   : > { %p716_p13 = scmp.ne.s32.totalorder %s1027_s11, %s715_s6  ;;  %p720_p12 = scmp.lt.u32.totalorder %s1027_s11, %s1115_s2 }
 0x131   : > { %p721_p0 = scmp.lt.u32.totalorder %s719_s10, %s715_s6  ;;  %p723_p2 = scmp.lt.u32.totalorder %s715_s6, %s1027_s11 }
 0x132   : > { %p717_p4 = pnand %p716_p13, %p1127_p8 }
 0x133   : > { %p722_p5 = por %p721_p0, %p720_p12 }
 0x134   : > { %p718_p6 = pneg %p717_p4 }
 0x135   : > { %p724_p9 = por %p723_p2, %p722_p5 }
 0x137   : > { %p725_p10 = pnand %p724_p9, %p718_p6 }
 0x139   : > { %728 = shalt.err (!%p725_p10)
}
 0x13a   : > { %547 = dma.vmem_to_hbm [thread:$0]  (%p1127_p8), %s1029_s26, 128, %s1027_s11, %s351_s20  }
 0x13b   : > { %s542_s5 = spop %541  ;;  %s1060_s6 = scalar_lea.hbm %s1116_s3, %s533_s8 }
 0x13c   : > { %v348_v33 = vstv %s542_s5  ;;  %s356_s21 = scalar_lea.sflag [#allocation11], %s1015_s24  ;;  %s729_s9 = scalar_lea.vmem %s1031_s7, 128 }
 0x13d   : > { %349 = vst [vmem:[%s1019_s30] sm:$0xff] %v348_v33  ;;  %p730_p11 = scmp.ne.s32.totalorder %s1031_s7, %s729_s9  ;;  %s847_s10 = smov [#allocation10]  }
 0x13e   : > { %s733_s15 = sshll.u32 %s847_s10, 4  ;;  %s734_s15 = int_to_ptr.vmem [resolvable:$false] %s733_s15 }
 0x13f   : > { %p731_p1 = pnand %p730_p11, %p1127_p8  ;;  %s735_s4 = scalar_lea.vmem %s734_s15, 256 }
 0x140   : > { %p736_p7 = scmp.lt.s32.totalorder %s1031_s7, %s734_s15  ;;  %p737_p13 = scmp.lt.s32.totalorder %s735_s4, %s729_s9 }
 0x141   : > { %p732_p3 = pneg %p731_p1 }
 0x142   : > { %p738_p4 = por %p737_p13, %p736_p7 }
 0x144   : > { %p739_p6 = pnand %p738_p4, %p732_p3 }
 0x146   : > { %742 = shalt.err (!%p739_p6)
}
 0x147   : > { %s743_s17 = scalar_lea.hbm %s1060_s6, 128  ;;  %s747_s26 = scalar_lea.hbm %s1116_s3, 256 }
 0x148   : > { %p744_p12 = scmp.ne.s32.totalorder %s1060_s6, %s743_s17  ;;  %p748_p2 = scmp.lt.u32.totalorder %s1060_s6, %s1116_s3 }
 0x149   : > { %p749_p9 = scmp.lt.u32.totalorder %s747_s26, %s743_s17  ;;  %p751_p11 = scmp.lt.u32.totalorder %s743_s17, %s1060_s6 }
 0x14a   : > { %p745_p0 = pnand %p744_p12, %p1127_p8 }
 0x14b   : > { %p750_p10 = por %p749_p9, %p748_p2 }
 0x14c   : > { %p746_p5 = pneg %p745_p0 }
 0x14d   : > { %p752_p1 = por %p751_p11, %p750_p10 }
 0x14f   : > { %p753_p3 = pnand %p752_p1, %p746_p5 }
 0x151   : > { %756 = shalt.err (!%p753_p3)
}
 0x152   : > { %548 = dma.vmem_to_hbm [thread:$0]  (%p1127_p8), %s1031_s7, 128, %s1060_s6, %s356_s21  }
 0x153 PF: > { %s394_s20 = sand.u32 1, %s812_s12   ;;  %p1128_p7 = scmp.ne.s32.totalorder %s1122_s29, 0 }
 0x154   : > { %p1129_p13 = scmp.ge.s32.totalorder %s840_s19, 2  ;;  %s395_s5 = scalar_lea.sflag [#allocation6], %s394_s20 }
 0x156   : > { %p559_p4 = pnand %p1129_p13, %p1128_p7 }
 0x158   : > { %802 = dma.done.wait (!%p559_p4), %s395_s5, 128  }
 0x159   : > { %804 = vsyncadd (!%p559_p4), %s395_s5, 4294967168  ;;  %s404_s23 = scalar_lea.sflag [#allocation11], %s394_s20 }
 0x15a   : > { %806 = dma.done.wait (!%p559_p4), %s404_s23, 128  }
 0x15b   : > { %808 = vsyncadd (!%p559_p4), %s404_s23, 4294967168  ;;  %s26_s19 = sadd.s32 1, %s840_s19   ;;  %s1130_s12 = smov %s816_s13 }
 0x15c   : > { %p23_p6 = scmp.ge.s32.totalorder %s26_s19, 4   ;;  %s1131_s13 = smov %s820_s14 }
 0x15d   : > { %s1132_s14 = smov %s926_s27  ;;  %s1133_s15 = smov %s828_s16 }
 0x15e   : > { %s1103_s16 = smov 0   ;;  %s1134_s17 = smov %s836_s18 }
 0x15f   : > { %s1135_s18 = smov %s1137_s22  ;;  %25 = sbr.rel (!%p23_p6) target bundleno = 11 (0xb), region = 111 }
 0x166   :  { %409 = vsyncpa [#allocation5], 1 }
 0x167   :  { %411 = vsyncpa [#allocation5 + $0x1], 1 }
 0x168   :  { %412 = vsyncpa [#allocation8], 1 }
 0x169   :  { %414 = vsyncpa [#allocation8 + $0x1], 1 }
 0x16a   :  { %415 = vsyncpa [#allocation6], 1 }
 0x16b   :  { %417 = vsyncpa [#allocation6 + $0x1], 1 }
 0x16c   :  { %418 = vsyncpa [#allocation11], 1 }
 0x16d   :  { %420 = vsyncpa [#allocation11 + $0x1], 1 }

</bundles_post_ra>
